<compile_context>
chip_gen: v5e
topology: v5e:2x2
jax: 0.10.0
libtpu: 0.0.40
codegen_flags: <defaults>
</compile_context>

<pallas_src>
import jax
import jax.numpy as jnp
from jax.experimental import pallas as pl
from jax.experimental.pallas import tpu as pltpu

# Offsets of each parameter inside the packed (128,) f32 SMEM slab.
W1_OFF, B1_OFF = 0, 40          # w1: (5, 8) row-major, b1: (8,)
W2_OFF, B2_OFF = 48, 80         # w2: (8, 4) row-major, b2: (4,)
W3_OFF, B3_OFF = 84, 88         # w3: (4, 1) row-major, b3: (1,)
PACKED_SIZE = 128               # pad to one lane-width of f32


def _dense_rows(p_ref, rows_in, n_in, n_out, w_off, b_off, relu):
    """Unrolled VPU dense layer in feature-major form.

    rows_in: list of n_in arrays shaped (1, tb) (batch on lanes).
    Returns list of n_out arrays shaped (1, tb).
    """
    rows_out = []
    for j in range(n_out):
        acc = rows_in[0] * p_ref[w_off + j]
        for i in range(1, n_in):
            acc = acc + rows_in[i] * p_ref[w_off + i * n_out + j]
        acc = acc + p_ref[b_off + j]
        if relu:
            acc = jnp.maximum(acc, 0.0)
        rows_out.append(acc)
    return rows_out


def carbon_mlp_kernel(p_ref, x_ref, o_ref):
    # p_ref: (128,) f32 in SMEM (all weights + biases, packed)
    # x_ref: (5, tb) f32 in VMEM (features on sublanes, batch on lanes)
    # o_ref: (1, tb) f32 in VMEM (lane-dense output row)
    x = x_ref[...]                                      # (5, tb)
    rows = [x[i:i + 1, :] for i in range(5)]            # 5 x (1, tb)
    h1 = _dense_rows(p_ref, rows, 5, 8, W1_OFF, B1_OFF, relu=True)
    h2 = _dense_rows(p_ref, h1, 8, 4, W2_OFF, B2_OFF, relu=True)
    out = _dense_rows(p_ref, h2, 4, 1, W3_OFF, B3_OFF, relu=False)
    o_ref[...] = out[0].astype(o_ref.dtype)


def pack_params(params):
    flat = jnp.concatenate([
        params["w1"].reshape(-1), params["b1"].reshape(-1),
        params["w2"].reshape(-1), params["b2"].reshape(-1),
        params["w3"].reshape(-1), params["b3"].reshape(-1),
    ]).astype(jnp.float32)
    return jnp.pad(flat, (0, PACKED_SIZE - flat.shape[0]))   # (128,)


def carbon_regressor(x, params, *, tb=512):
    """x: (B, 5) float32; params: dict of (in,out) weights / (out,) biases.

    Returns (B, 1) float32, matching the PyTorch module's forward.
    """
    B, F = x.shape
    assert F == 5
    assert tb % 128 == 0
    # Don't tile wider than the 128-padded batch: small batches stay cheap,
    # large batches get big lane-dense tiles (and >=2 grid steps for B >= 2*tb,
    # so v7x's second TensorCore gets work).
    tb = min(tb, max(128, pl.cdiv(B, 128) * 128))
    b_pad = pl.cdiv(B, tb) * tb

    xt = x.T.astype(jnp.float32)                        # (5, B) feature-major
    if b_pad != B:
        xt = jnp.pad(xt, ((0, 0), (0, b_pad - B)))

    packed = pack_params(params)                        # (128,) f32 -> SMEM

    out = pl.pallas_call(
        carbon_mlp_kernel,
        out_shape=jax.ShapeDtypeStruct((1, b_pad), jnp.float32),
        grid_spec=pltpu.PrefetchScalarGridSpec(
            num_scalar_prefetch=0,
            grid=(b_pad // tb,),
            in_specs=[
                pl.BlockSpec(memory_space=pltpu.MemorySpace.SMEM),  # packed params
                pl.BlockSpec((5, tb), lambda i: (0, i)),            # x tile
            ],
            out_specs=pl.BlockSpec((1, tb), lambda i: (0, i)),      # lane-dense
        ),
        compiler_params=pltpu.CompilerParams(
            dimension_semantics=("parallel",),
            vmem_limit_bytes=32 * 1024 * 1024,
        ),
    )(packed, xt)

    return out[0, :B].reshape(B, 1)


def init_params(key):
    """Deterministic init mirroring nn.Linear shapes (weights stored (in, out))."""
    ks = jax.random.split(key, 6)

    def linear(kw, kb, fan_in, fan_out):
        bound = 1.0 / jnp.sqrt(fan_in)
        w = jax.random.uniform(kw, (fan_in, fan_out), jnp.float32, -bound, bound)
        b = jax.random.uniform(kb, (fan_out,), jnp.float32, -bound, bound)
        return w, b

    w1, b1 = linear(ks[0], ks[1], 5, 8)
    w2, b2 = linear(ks[2], ks[3], 8, 4)
    w3, b3 = linear(ks[4], ks[5], 4, 1)
    return {"w1": w1, "b1": b1, "w2": w2, "b2": b2, "w3": w3, "b3": b3}


def reference_forward(x, p):
    h1 = jnp.maximum(x @ p["w1"] + p["b1"], 0.0)
    h2 = jnp.maximum(h1 @ p["w2"] + p["b2"], 0.0)
    return h2 @ p["w3"] + p["b3"]


if __name__ == "__main__":
    key = jax.random.PRNGKey(0)
    k_params, k_x = jax.random.split(key)

    params = init_params(k_params)
    x = jax.random.normal(k_x, (16, 5), jnp.float32)    # batch=16, features=5

    out = carbon_regressor(x, params)
    out = jax.block_until_ready(out)

    ref = reference_forward(x, params)
    assert out.shape == (16, 1)
    assert jnp.allclose(out, ref, atol=1e-5, rtol=1e-5)

    print("KERNEL_OK")
</pallas_src>

<mosaic_0001>
module attributes {stable_mosaic.version = 11 : i64} {
  func.func @carbon_mlp_kernel(%arg0: i32, %arg1: memref<128xf32, #tpu.memory_space<smem>>, %arg2: memref<5x128xf32, #tpu.memory_space<vmem>>, %arg3: memref<1x128xf32, #tpu.memory_space<vmem>>) attributes {dimension_semantics = [#tpu.dimension_semantics<parallel>], iteration_bounds = array<i64: 1>, scalar_prefetch = 0 : i64, scratch_operands = 0 : i64, tpu.core_type = #tpu.core_type<tc>, window_params = [{transform_indices = @transform_0, window_bounds = array<i64: 128>}, {transform_indices = @transform_1, window_bounds = array<i64: 5, 128>}, {transform_indices = @transform_2, window_bounds = array<i64: 1, 128>}]} {
    %c0 = arith.constant 0 : index
    %c0_0 = arith.constant 0 : index
    %0 = vector.load %arg2[%c0, %c0_0] : memref<5x128xf32, #tpu.memory_space<vmem>>, vector<5x128xf32>
    %1 = vector.extract_strided_slice %0 {offsets = [0, 0], sizes = [1, 128], strides = [1, 1]} : vector<5x128xf32> to vector<1x128xf32>
    %2 = vector.extract_strided_slice %0 {offsets = [1, 0], sizes = [1, 128], strides = [1, 1]} : vector<5x128xf32> to vector<1x128xf32>
    %3 = vector.extract_strided_slice %0 {offsets = [2, 0], sizes = [1, 128], strides = [1, 1]} : vector<5x128xf32> to vector<1x128xf32>
    %4 = vector.extract_strided_slice %0 {offsets = [3, 0], sizes = [1, 128], strides = [1, 1]} : vector<5x128xf32> to vector<1x128xf32>
    %5 = vector.extract_strided_slice %0 {offsets = [4, 0], sizes = [1, 128], strides = [1, 1]} : vector<5x128xf32> to vector<1x128xf32>
    %c0_1 = arith.constant 0 : index
    %6 = memref.load %arg1[%c0_1] : memref<128xf32, #tpu.memory_space<smem>>
    %7 = vector.broadcast %6 : f32 to vector<1x128xf32>
    %8 = arith.mulf %1, %7 : vector<1x128xf32>
    %c8 = arith.constant 8 : index
    %9 = memref.load %arg1[%c8] : memref<128xf32, #tpu.memory_space<smem>>
    %10 = vector.broadcast %9 : f32 to vector<1x128xf32>
    %11 = arith.mulf %2, %10 : vector<1x128xf32>
    %12 = arith.addf %8, %11 : vector<1x128xf32>
    %c16 = arith.constant 16 : index
    %13 = memref.load %arg1[%c16] : memref<128xf32, #tpu.memory_space<smem>>
    %14 = vector.broadcast %13 : f32 to vector<1x128xf32>
    %15 = arith.mulf %3, %14 : vector<1x128xf32>
    %16 = arith.addf %12, %15 : vector<1x128xf32>
    %c24 = arith.constant 24 : index
    %17 = memref.load %arg1[%c24] : memref<128xf32, #tpu.memory_space<smem>>
    %18 = vector.broadcast %17 : f32 to vector<1x128xf32>
    %19 = arith.mulf %4, %18 : vector<1x128xf32>
    %20 = arith.addf %16, %19 : vector<1x128xf32>
    %c32 = arith.constant 32 : index
    %21 = memref.load %arg1[%c32] : memref<128xf32, #tpu.memory_space<smem>>
    %22 = vector.broadcast %21 : f32 to vector<1x128xf32>
    %23 = arith.mulf %5, %22 : vector<1x128xf32>
    %24 = arith.addf %20, %23 : vector<1x128xf32>
    %c40 = arith.constant 40 : index
    %25 = memref.load %arg1[%c40] : memref<128xf32, #tpu.memory_space<smem>>
    %26 = vector.broadcast %25 : f32 to vector<1x128xf32>
    %27 = arith.addf %24, %26 : vector<1x128xf32>
    %cst = arith.constant 0.000000e+00 : f32
    %28 = vector.broadcast %cst : f32 to vector<1x128xf32>
    %29 = arith.maximumf %27, %28 : vector<1x128xf32>
    %c1 = arith.constant 1 : index
    %30 = memref.load %arg1[%c1] : memref<128xf32, #tpu.memory_space<smem>>
    %31 = vector.broadcast %30 : f32 to vector<1x128xf32>
    %32 = arith.mulf %1, %31 : vector<1x128xf32>
    %c9 = arith.constant 9 : index
    %33 = memref.load %arg1[%c9] : memref<128xf32, #tpu.memory_space<smem>>
    %34 = vector.broadcast %33 : f32 to vector<1x128xf32>
    %35 = arith.mulf %2, %34 : vector<1x128xf32>
    %36 = arith.addf %32, %35 : vector<1x128xf32>
    %c17 = arith.constant 17 : index
    %37 = memref.load %arg1[%c17] : memref<128xf32, #tpu.memory_space<smem>>
    %38 = vector.broadcast %37 : f32 to vector<1x128xf32>
    %39 = arith.mulf %3, %38 : vector<1x128xf32>
    %40 = arith.addf %36, %39 : vector<1x128xf32>
    %c25 = arith.constant 25 : index
    %41 = memref.load %arg1[%c25] : memref<128xf32, #tpu.memory_space<smem>>
    %42 = vector.broadcast %41 : f32 to vector<1x128xf32>
    %43 = arith.mulf %4, %42 : vector<1x128xf32>
    %44 = arith.addf %40, %43 : vector<1x128xf32>
    %c33 = arith.constant 33 : index
    %45 = memref.load %arg1[%c33] : memref<128xf32, #tpu.memory_space<smem>>
    %46 = vector.broadcast %45 : f32 to vector<1x128xf32>
    %47 = arith.mulf %5, %46 : vector<1x128xf32>
    %48 = arith.addf %44, %47 : vector<1x128xf32>
    %c41 = arith.constant 41 : index
    %49 = memref.load %arg1[%c41] : memref<128xf32, #tpu.memory_space<smem>>
    %50 = vector.broadcast %49 : f32 to vector<1x128xf32>
    %51 = arith.addf %48, %50 : vector<1x128xf32>
    %cst_2 = arith.constant 0.000000e+00 : f32
    %52 = vector.broadcast %cst_2 : f32 to vector<1x128xf32>
    %53 = arith.maximumf %51, %52 : vector<1x128xf32>
    %c2 = arith.constant 2 : index
    %54 = memref.load %arg1[%c2] : memref<128xf32, #tpu.memory_space<smem>>
    %55 = vector.broadcast %54 : f32 to vector<1x128xf32>
    %56 = arith.mulf %1, %55 : vector<1x128xf32>
    %c10 = arith.constant 10 : index
    %57 = memref.load %arg1[%c10] : memref<128xf32, #tpu.memory_space<smem>>
    %58 = vector.broadcast %57 : f32 to vector<1x128xf32>
    %59 = arith.mulf %2, %58 : vector<1x128xf32>
    %60 = arith.addf %56, %59 : vector<1x128xf32>
    %c18 = arith.constant 18 : index
    %61 = memref.load %arg1[%c18] : memref<128xf32, #tpu.memory_space<smem>>
    %62 = vector.broadcast %61 : f32 to vector<1x128xf32>
    %63 = arith.mulf %3, %62 : vector<1x128xf32>
    %64 = arith.addf %60, %63 : vector<1x128xf32>
    %c26 = arith.constant 26 : index
    %65 = memref.load %arg1[%c26] : memref<128xf32, #tpu.memory_space<smem>>
    %66 = vector.broadcast %65 : f32 to vector<1x128xf32>
    %67 = arith.mulf %4, %66 : vector<1x128xf32>
    %68 = arith.addf %64, %67 : vector<1x128xf32>
    %c34 = arith.constant 34 : index
    %69 = memref.load %arg1[%c34] : memref<128xf32, #tpu.memory_space<smem>>
    %70 = vector.broadcast %69 : f32 to vector<1x128xf32>
    %71 = arith.mulf %5, %70 : vector<1x128xf32>
    %72 = arith.addf %68, %71 : vector<1x128xf32>
    %c42 = arith.constant 42 : index
    %73 = memref.load %arg1[%c42] : memref<128xf32, #tpu.memory_space<smem>>
    %74 = vector.broadcast %73 : f32 to vector<1x128xf32>
    %75 = arith.addf %72, %74 : vector<1x128xf32>
    %cst_3 = arith.constant 0.000000e+00 : f32
    %76 = vector.broadcast %cst_3 : f32 to vector<1x128xf32>
    %77 = arith.maximumf %75, %76 : vector<1x128xf32>
    %c3 = arith.constant 3 : index
    %78 = memref.load %arg1[%c3] : memref<128xf32, #tpu.memory_space<smem>>
    %79 = vector.broadcast %78 : f32 to vector<1x128xf32>
    %80 = arith.mulf %1, %79 : vector<1x128xf32>
    %c11 = arith.constant 11 : index
    %81 = memref.load %arg1[%c11] : memref<128xf32, #tpu.memory_space<smem>>
    %82 = vector.broadcast %81 : f32 to vector<1x128xf32>
    %83 = arith.mulf %2, %82 : vector<1x128xf32>
    %84 = arith.addf %80, %83 : vector<1x128xf32>
    %c19 = arith.constant 19 : index
    %85 = memref.load %arg1[%c19] : memref<128xf32, #tpu.memory_space<smem>>
    %86 = vector.broadcast %85 : f32 to vector<1x128xf32>
    %87 = arith.mulf %3, %86 : vector<1x128xf32>
    %88 = arith.addf %84, %87 : vector<1x128xf32>
    %c27 = arith.constant 27 : index
    %89 = memref.load %arg1[%c27] : memref<128xf32, #tpu.memory_space<smem>>
    %90 = vector.broadcast %89 : f32 to vector<1x128xf32>
    %91 = arith.mulf %4, %90 : vector<1x128xf32>
    %92 = arith.addf %88, %91 : vector<1x128xf32>
    %c35 = arith.constant 35 : index
    %93 = memref.load %arg1[%c35] : memref<128xf32, #tpu.memory_space<smem>>
    %94 = vector.broadcast %93 : f32 to vector<1x128xf32>
    %95 = arith.mulf %5, %94 : vector<1x128xf32>
    %96 = arith.addf %92, %95 : vector<1x128xf32>
    %c43 = arith.constant 43 : index
    %97 = memref.load %arg1[%c43] : memref<128xf32, #tpu.memory_space<smem>>
    %98 = vector.broadcast %97 : f32 to vector<1x128xf32>
    %99 = arith.addf %96, %98 : vector<1x128xf32>
    %cst_4 = arith.constant 0.000000e+00 : f32
    %100 = vector.broadcast %cst_4 : f32 to vector<1x128xf32>
    %101 = arith.maximumf %99, %100 : vector<1x128xf32>
    %c4 = arith.constant 4 : index
    %102 = memref.load %arg1[%c4] : memref<128xf32, #tpu.memory_space<smem>>
    %103 = vector.broadcast %102 : f32 to vector<1x128xf32>
    %104 = arith.mulf %1, %103 : vector<1x128xf32>
    %c12 = arith.constant 12 : index
    %105 = memref.load %arg1[%c12] : memref<128xf32, #tpu.memory_space<smem>>
    %106 = vector.broadcast %105 : f32 to vector<1x128xf32>
    %107 = arith.mulf %2, %106 : vector<1x128xf32>
    %108 = arith.addf %104, %107 : vector<1x128xf32>
    %c20 = arith.constant 20 : index
    %109 = memref.load %arg1[%c20] : memref<128xf32, #tpu.memory_space<smem>>
    %110 = vector.broadcast %109 : f32 to vector<1x128xf32>
    %111 = arith.mulf %3, %110 : vector<1x128xf32>
    %112 = arith.addf %108, %111 : vector<1x128xf32>
    %c28 = arith.constant 28 : index
    %113 = memref.load %arg1[%c28] : memref<128xf32, #tpu.memory_space<smem>>
    %114 = vector.broadcast %113 : f32 to vector<1x128xf32>
    %115 = arith.mulf %4, %114 : vector<1x128xf32>
    %116 = arith.addf %112, %115 : vector<1x128xf32>
    %c36 = arith.constant 36 : index
    %117 = memref.load %arg1[%c36] : memref<128xf32, #tpu.memory_space<smem>>
    %118 = vector.broadcast %117 : f32 to vector<1x128xf32>
    %119 = arith.mulf %5, %118 : vector<1x128xf32>
    %120 = arith.addf %116, %119 : vector<1x128xf32>
    %c44 = arith.constant 44 : index
    %121 = memref.load %arg1[%c44] : memref<128xf32, #tpu.memory_space<smem>>
    %122 = vector.broadcast %121 : f32 to vector<1x128xf32>
    %123 = arith.addf %120, %122 : vector<1x128xf32>
    %cst_5 = arith.constant 0.000000e+00 : f32
    %124 = vector.broadcast %cst_5 : f32 to vector<1x128xf32>
    %125 = arith.maximumf %123, %124 : vector<1x128xf32>
    %c5 = arith.constant 5 : index
    %126 = memref.load %arg1[%c5] : memref<128xf32, #tpu.memory_space<smem>>
    %127 = vector.broadcast %126 : f32 to vector<1x128xf32>
    %128 = arith.mulf %1, %127 : vector<1x128xf32>
    %c13 = arith.constant 13 : index
    %129 = memref.load %arg1[%c13] : memref<128xf32, #tpu.memory_space<smem>>
    %130 = vector.broadcast %129 : f32 to vector<1x128xf32>
    %131 = arith.mulf %2, %130 : vector<1x128xf32>
    %132 = arith.addf %128, %131 : vector<1x128xf32>
    %c21 = arith.constant 21 : index
    %133 = memref.load %arg1[%c21] : memref<128xf32, #tpu.memory_space<smem>>
    %134 = vector.broadcast %133 : f32 to vector<1x128xf32>
    %135 = arith.mulf %3, %134 : vector<1x128xf32>
    %136 = arith.addf %132, %135 : vector<1x128xf32>
    %c29 = arith.constant 29 : index
    %137 = memref.load %arg1[%c29] : memref<128xf32, #tpu.memory_space<smem>>
    %138 = vector.broadcast %137 : f32 to vector<1x128xf32>
    %139 = arith.mulf %4, %138 : vector<1x128xf32>
    %140 = arith.addf %136, %139 : vector<1x128xf32>
    %c37 = arith.constant 37 : index
    %141 = memref.load %arg1[%c37] : memref<128xf32, #tpu.memory_space<smem>>
    %142 = vector.broadcast %141 : f32 to vector<1x128xf32>
    %143 = arith.mulf %5, %142 : vector<1x128xf32>
    %144 = arith.addf %140, %143 : vector<1x128xf32>
    %c45 = arith.constant 45 : index
    %145 = memref.load %arg1[%c45] : memref<128xf32, #tpu.memory_space<smem>>
    %146 = vector.broadcast %145 : f32 to vector<1x128xf32>
    %147 = arith.addf %144, %146 : vector<1x128xf32>
    %cst_6 = arith.constant 0.000000e+00 : f32
    %148 = vector.broadcast %cst_6 : f32 to vector<1x128xf32>
    %149 = arith.maximumf %147, %148 : vector<1x128xf32>
    %c6 = arith.constant 6 : index
    %150 = memref.load %arg1[%c6] : memref<128xf32, #tpu.memory_space<smem>>
    %151 = vector.broadcast %150 : f32 to vector<1x128xf32>
    %152 = arith.mulf %1, %151 : vector<1x128xf32>
    %c14 = arith.constant 14 : index
    %153 = memref.load %arg1[%c14] : memref<128xf32, #tpu.memory_space<smem>>
    %154 = vector.broadcast %153 : f32 to vector<1x128xf32>
    %155 = arith.mulf %2, %154 : vector<1x128xf32>
    %156 = arith.addf %152, %155 : vector<1x128xf32>
    %c22 = arith.constant 22 : index
    %157 = memref.load %arg1[%c22] : memref<128xf32, #tpu.memory_space<smem>>
    %158 = vector.broadcast %157 : f32 to vector<1x128xf32>
    %159 = arith.mulf %3, %158 : vector<1x128xf32>
    %160 = arith.addf %156, %159 : vector<1x128xf32>
    %c30 = arith.constant 30 : index
    %161 = memref.load %arg1[%c30] : memref<128xf32, #tpu.memory_space<smem>>
    %162 = vector.broadcast %161 : f32 to vector<1x128xf32>
    %163 = arith.mulf %4, %162 : vector<1x128xf32>
    %164 = arith.addf %160, %163 : vector<1x128xf32>
    %c38 = arith.constant 38 : index
    %165 = memref.load %arg1[%c38] : memref<128xf32, #tpu.memory_space<smem>>
    %166 = vector.broadcast %165 : f32 to vector<1x128xf32>
    %167 = arith.mulf %5, %166 : vector<1x128xf32>
    %168 = arith.addf %164, %167 : vector<1x128xf32>
    %c46 = arith.constant 46 : index
    %169 = memref.load %arg1[%c46] : memref<128xf32, #tpu.memory_space<smem>>
    %170 = vector.broadcast %169 : f32 to vector<1x128xf32>
    %171 = arith.addf %168, %170 : vector<1x128xf32>
    %cst_7 = arith.constant 0.000000e+00 : f32
    %172 = vector.broadcast %cst_7 : f32 to vector<1x128xf32>
    %173 = arith.maximumf %171, %172 : vector<1x128xf32>
    %c7 = arith.constant 7 : index
    %174 = memref.load %arg1[%c7] : memref<128xf32, #tpu.memory_space<smem>>
    %175 = vector.broadcast %174 : f32 to vector<1x128xf32>
    %176 = arith.mulf %1, %175 : vector<1x128xf32>
    %c15 = arith.constant 15 : index
    %177 = memref.load %arg1[%c15] : memref<128xf32, #tpu.memory_space<smem>>
    %178 = vector.broadcast %177 : f32 to vector<1x128xf32>
    %179 = arith.mulf %2, %178 : vector<1x128xf32>
    %180 = arith.addf %176, %179 : vector<1x128xf32>
    %c23 = arith.constant 23 : index
    %181 = memref.load %arg1[%c23] : memref<128xf32, #tpu.memory_space<smem>>
    %182 = vector.broadcast %181 : f32 to vector<1x128xf32>
    %183 = arith.mulf %3, %182 : vector<1x128xf32>
    %184 = arith.addf %180, %183 : vector<1x128xf32>
    %c31 = arith.constant 31 : index
    %185 = memref.load %arg1[%c31] : memref<128xf32, #tpu.memory_space<smem>>
    %186 = vector.broadcast %185 : f32 to vector<1x128xf32>
    %187 = arith.mulf %4, %186 : vector<1x128xf32>
    %188 = arith.addf %184, %187 : vector<1x128xf32>
    %c39 = arith.constant 39 : index
    %189 = memref.load %arg1[%c39] : memref<128xf32, #tpu.memory_space<smem>>
    %190 = vector.broadcast %189 : f32 to vector<1x128xf32>
    %191 = arith.mulf %5, %190 : vector<1x128xf32>
    %192 = arith.addf %188, %191 : vector<1x128xf32>
    %c47 = arith.constant 47 : index
    %193 = memref.load %arg1[%c47] : memref<128xf32, #tpu.memory_space<smem>>
    %194 = vector.broadcast %193 : f32 to vector<1x128xf32>
    %195 = arith.addf %192, %194 : vector<1x128xf32>
    %cst_8 = arith.constant 0.000000e+00 : f32
    %196 = vector.broadcast %cst_8 : f32 to vector<1x128xf32>
    %197 = arith.maximumf %195, %196 : vector<1x128xf32>
    %c48 = arith.constant 48 : index
    %198 = memref.load %arg1[%c48] : memref<128xf32, #tpu.memory_space<smem>>
    %199 = vector.broadcast %198 : f32 to vector<1x128xf32>
    %200 = arith.mulf %29, %199 : vector<1x128xf32>
    %c52 = arith.constant 52 : index
    %201 = memref.load %arg1[%c52] : memref<128xf32, #tpu.memory_space<smem>>
    %202 = vector.broadcast %201 : f32 to vector<1x128xf32>
    %203 = arith.mulf %53, %202 : vector<1x128xf32>
    %204 = arith.addf %200, %203 : vector<1x128xf32>
    %c56 = arith.constant 56 : index
    %205 = memref.load %arg1[%c56] : memref<128xf32, #tpu.memory_space<smem>>
    %206 = vector.broadcast %205 : f32 to vector<1x128xf32>
    %207 = arith.mulf %77, %206 : vector<1x128xf32>
    %208 = arith.addf %204, %207 : vector<1x128xf32>
    %c60 = arith.constant 60 : index
    %209 = memref.load %arg1[%c60] : memref<128xf32, #tpu.memory_space<smem>>
    %210 = vector.broadcast %209 : f32 to vector<1x128xf32>
    %211 = arith.mulf %101, %210 : vector<1x128xf32>
    %212 = arith.addf %208, %211 : vector<1x128xf32>
    %c64 = arith.constant 64 : index
    %213 = memref.load %arg1[%c64] : memref<128xf32, #tpu.memory_space<smem>>
    %214 = vector.broadcast %213 : f32 to vector<1x128xf32>
    %215 = arith.mulf %125, %214 : vector<1x128xf32>
    %216 = arith.addf %212, %215 : vector<1x128xf32>
    %c68 = arith.constant 68 : index
    %217 = memref.load %arg1[%c68] : memref<128xf32, #tpu.memory_space<smem>>
    %218 = vector.broadcast %217 : f32 to vector<1x128xf32>
    %219 = arith.mulf %149, %218 : vector<1x128xf32>
    %220 = arith.addf %216, %219 : vector<1x128xf32>
    %c72 = arith.constant 72 : index
    %221 = memref.load %arg1[%c72] : memref<128xf32, #tpu.memory_space<smem>>
    %222 = vector.broadcast %221 : f32 to vector<1x128xf32>
    %223 = arith.mulf %173, %222 : vector<1x128xf32>
    %224 = arith.addf %220, %223 : vector<1x128xf32>
    %c76 = arith.constant 76 : index
    %225 = memref.load %arg1[%c76] : memref<128xf32, #tpu.memory_space<smem>>
    %226 = vector.broadcast %225 : f32 to vector<1x128xf32>
    %227 = arith.mulf %197, %226 : vector<1x128xf32>
    %228 = arith.addf %224, %227 : vector<1x128xf32>
    %c80 = arith.constant 80 : index
    %229 = memref.load %arg1[%c80] : memref<128xf32, #tpu.memory_space<smem>>
    %230 = vector.broadcast %229 : f32 to vector<1x128xf32>
    %231 = arith.addf %228, %230 : vector<1x128xf32>
    %cst_9 = arith.constant 0.000000e+00 : f32
    %232 = vector.broadcast %cst_9 : f32 to vector<1x128xf32>
    %233 = arith.maximumf %231, %232 : vector<1x128xf32>
    %c49 = arith.constant 49 : index
    %234 = memref.load %arg1[%c49] : memref<128xf32, #tpu.memory_space<smem>>
    %235 = vector.broadcast %234 : f32 to vector<1x128xf32>
    %236 = arith.mulf %29, %235 : vector<1x128xf32>
    %c53 = arith.constant 53 : index
    %237 = memref.load %arg1[%c53] : memref<128xf32, #tpu.memory_space<smem>>
    %238 = vector.broadcast %237 : f32 to vector<1x128xf32>
    %239 = arith.mulf %53, %238 : vector<1x128xf32>
    %240 = arith.addf %236, %239 : vector<1x128xf32>
    %c57 = arith.constant 57 : index
    %241 = memref.load %arg1[%c57] : memref<128xf32, #tpu.memory_space<smem>>
    %242 = vector.broadcast %241 : f32 to vector<1x128xf32>
    %243 = arith.mulf %77, %242 : vector<1x128xf32>
    %244 = arith.addf %240, %243 : vector<1x128xf32>
    %c61 = arith.constant 61 : index
    %245 = memref.load %arg1[%c61] : memref<128xf32, #tpu.memory_space<smem>>
    %246 = vector.broadcast %245 : f32 to vector<1x128xf32>
    %247 = arith.mulf %101, %246 : vector<1x128xf32>
    %248 = arith.addf %244, %247 : vector<1x128xf32>
    %c65 = arith.constant 65 : index
    %249 = memref.load %arg1[%c65] : memref<128xf32, #tpu.memory_space<smem>>
    %250 = vector.broadcast %249 : f32 to vector<1x128xf32>
    %251 = arith.mulf %125, %250 : vector<1x128xf32>
    %252 = arith.addf %248, %251 : vector<1x128xf32>
    %c69 = arith.constant 69 : index
    %253 = memref.load %arg1[%c69] : memref<128xf32, #tpu.memory_space<smem>>
    %254 = vector.broadcast %253 : f32 to vector<1x128xf32>
    %255 = arith.mulf %149, %254 : vector<1x128xf32>
    %256 = arith.addf %252, %255 : vector<1x128xf32>
    %c73 = arith.constant 73 : index
    %257 = memref.load %arg1[%c73] : memref<128xf32, #tpu.memory_space<smem>>
    %258 = vector.broadcast %257 : f32 to vector<1x128xf32>
    %259 = arith.mulf %173, %258 : vector<1x128xf32>
    %260 = arith.addf %256, %259 : vector<1x128xf32>
    %c77 = arith.constant 77 : index
    %261 = memref.load %arg1[%c77] : memref<128xf32, #tpu.memory_space<smem>>
    %262 = vector.broadcast %261 : f32 to vector<1x128xf32>
    %263 = arith.mulf %197, %262 : vector<1x128xf32>
    %264 = arith.addf %260, %263 : vector<1x128xf32>
    %c81 = arith.constant 81 : index
    %265 = memref.load %arg1[%c81] : memref<128xf32, #tpu.memory_space<smem>>
    %266 = vector.broadcast %265 : f32 to vector<1x128xf32>
    %267 = arith.addf %264, %266 : vector<1x128xf32>
    %cst_10 = arith.constant 0.000000e+00 : f32
    %268 = vector.broadcast %cst_10 : f32 to vector<1x128xf32>
    %269 = arith.maximumf %267, %268 : vector<1x128xf32>
    %c50 = arith.constant 50 : index
    %270 = memref.load %arg1[%c50] : memref<128xf32, #tpu.memory_space<smem>>
    %271 = vector.broadcast %270 : f32 to vector<1x128xf32>
    %272 = arith.mulf %29, %271 : vector<1x128xf32>
    %c54 = arith.constant 54 : index
    %273 = memref.load %arg1[%c54] : memref<128xf32, #tpu.memory_space<smem>>
    %274 = vector.broadcast %273 : f32 to vector<1x128xf32>
    %275 = arith.mulf %53, %274 : vector<1x128xf32>
    %276 = arith.addf %272, %275 : vector<1x128xf32>
    %c58 = arith.constant 58 : index
    %277 = memref.load %arg1[%c58] : memref<128xf32, #tpu.memory_space<smem>>
    %278 = vector.broadcast %277 : f32 to vector<1x128xf32>
    %279 = arith.mulf %77, %278 : vector<1x128xf32>
    %280 = arith.addf %276, %279 : vector<1x128xf32>
    %c62 = arith.constant 62 : index
    %281 = memref.load %arg1[%c62] : memref<128xf32, #tpu.memory_space<smem>>
    %282 = vector.broadcast %281 : f32 to vector<1x128xf32>
    %283 = arith.mulf %101, %282 : vector<1x128xf32>
    %284 = arith.addf %280, %283 : vector<1x128xf32>
    %c66 = arith.constant 66 : index
    %285 = memref.load %arg1[%c66] : memref<128xf32, #tpu.memory_space<smem>>
    %286 = vector.broadcast %285 : f32 to vector<1x128xf32>
    %287 = arith.mulf %125, %286 : vector<1x128xf32>
    %288 = arith.addf %284, %287 : vector<1x128xf32>
    %c70 = arith.constant 70 : index
    %289 = memref.load %arg1[%c70] : memref<128xf32, #tpu.memory_space<smem>>
    %290 = vector.broadcast %289 : f32 to vector<1x128xf32>
    %291 = arith.mulf %149, %290 : vector<1x128xf32>
    %292 = arith.addf %288, %291 : vector<1x128xf32>
    %c74 = arith.constant 74 : index
    %293 = memref.load %arg1[%c74] : memref<128xf32, #tpu.memory_space<smem>>
    %294 = vector.broadcast %293 : f32 to vector<1x128xf32>
    %295 = arith.mulf %173, %294 : vector<1x128xf32>
    %296 = arith.addf %292, %295 : vector<1x128xf32>
    %c78 = arith.constant 78 : index
    %297 = memref.load %arg1[%c78] : memref<128xf32, #tpu.memory_space<smem>>
    %298 = vector.broadcast %297 : f32 to vector<1x128xf32>
    %299 = arith.mulf %197, %298 : vector<1x128xf32>
    %300 = arith.addf %296, %299 : vector<1x128xf32>
    %c82 = arith.constant 82 : index
    %301 = memref.load %arg1[%c82] : memref<128xf32, #tpu.memory_space<smem>>
    %302 = vector.broadcast %301 : f32 to vector<1x128xf32>
    %303 = arith.addf %300, %302 : vector<1x128xf32>
    %cst_11 = arith.constant 0.000000e+00 : f32
    %304 = vector.broadcast %cst_11 : f32 to vector<1x128xf32>
    %305 = arith.maximumf %303, %304 : vector<1x128xf32>
    %c51 = arith.constant 51 : index
    %306 = memref.load %arg1[%c51] : memref<128xf32, #tpu.memory_space<smem>>
    %307 = vector.broadcast %306 : f32 to vector<1x128xf32>
    %308 = arith.mulf %29, %307 : vector<1x128xf32>
    %c55 = arith.constant 55 : index
    %309 = memref.load %arg1[%c55] : memref<128xf32, #tpu.memory_space<smem>>
    %310 = vector.broadcast %309 : f32 to vector<1x128xf32>
    %311 = arith.mulf %53, %310 : vector<1x128xf32>
    %312 = arith.addf %308, %311 : vector<1x128xf32>
    %c59 = arith.constant 59 : index
    %313 = memref.load %arg1[%c59] : memref<128xf32, #tpu.memory_space<smem>>
    %314 = vector.broadcast %313 : f32 to vector<1x128xf32>
    %315 = arith.mulf %77, %314 : vector<1x128xf32>
    %316 = arith.addf %312, %315 : vector<1x128xf32>
    %c63 = arith.constant 63 : index
    %317 = memref.load %arg1[%c63] : memref<128xf32, #tpu.memory_space<smem>>
    %318 = vector.broadcast %317 : f32 to vector<1x128xf32>
    %319 = arith.mulf %101, %318 : vector<1x128xf32>
    %320 = arith.addf %316, %319 : vector<1x128xf32>
    %c67 = arith.constant 67 : index
    %321 = memref.load %arg1[%c67] : memref<128xf32, #tpu.memory_space<smem>>
    %322 = vector.broadcast %321 : f32 to vector<1x128xf32>
    %323 = arith.mulf %125, %322 : vector<1x128xf32>
    %324 = arith.addf %320, %323 : vector<1x128xf32>
    %c71 = arith.constant 71 : index
    %325 = memref.load %arg1[%c71] : memref<128xf32, #tpu.memory_space<smem>>
    %326 = vector.broadcast %325 : f32 to vector<1x128xf32>
    %327 = arith.mulf %149, %326 : vector<1x128xf32>
    %328 = arith.addf %324, %327 : vector<1x128xf32>
    %c75 = arith.constant 75 : index
    %329 = memref.load %arg1[%c75] : memref<128xf32, #tpu.memory_space<smem>>
    %330 = vector.broadcast %329 : f32 to vector<1x128xf32>
    %331 = arith.mulf %173, %330 : vector<1x128xf32>
    %332 = arith.addf %328, %331 : vector<1x128xf32>
    %c79 = arith.constant 79 : index
    %333 = memref.load %arg1[%c79] : memref<128xf32, #tpu.memory_space<smem>>
    %334 = vector.broadcast %333 : f32 to vector<1x128xf32>
    %335 = arith.mulf %197, %334 : vector<1x128xf32>
    %336 = arith.addf %332, %335 : vector<1x128xf32>
    %c83 = arith.constant 83 : index
    %337 = memref.load %arg1[%c83] : memref<128xf32, #tpu.memory_space<smem>>
    %338 = vector.broadcast %337 : f32 to vector<1x128xf32>
    %339 = arith.addf %336, %338 : vector<1x128xf32>
    %cst_12 = arith.constant 0.000000e+00 : f32
    %340 = vector.broadcast %cst_12 : f32 to vector<1x128xf32>
    %341 = arith.maximumf %339, %340 : vector<1x128xf32>
    %c84 = arith.constant 84 : index
    %342 = memref.load %arg1[%c84] : memref<128xf32, #tpu.memory_space<smem>>
    %343 = vector.broadcast %342 : f32 to vector<1x128xf32>
    %344 = arith.mulf %233, %343 : vector<1x128xf32>
    %c85 = arith.constant 85 : index
    %345 = memref.load %arg1[%c85] : memref<128xf32, #tpu.memory_space<smem>>
    %346 = vector.broadcast %345 : f32 to vector<1x128xf32>
    %347 = arith.mulf %269, %346 : vector<1x128xf32>
    %348 = arith.addf %344, %347 : vector<1x128xf32>
    %c86 = arith.constant 86 : index
    %349 = memref.load %arg1[%c86] : memref<128xf32, #tpu.memory_space<smem>>
    %350 = vector.broadcast %349 : f32 to vector<1x128xf32>
    %351 = arith.mulf %305, %350 : vector<1x128xf32>
    %352 = arith.addf %348, %351 : vector<1x128xf32>
    %c87 = arith.constant 87 : index
    %353 = memref.load %arg1[%c87] : memref<128xf32, #tpu.memory_space<smem>>
    %354 = vector.broadcast %353 : f32 to vector<1x128xf32>
    %355 = arith.mulf %341, %354 : vector<1x128xf32>
    %356 = arith.addf %352, %355 : vector<1x128xf32>
    %c88 = arith.constant 88 : index
    %357 = memref.load %arg1[%c88] : memref<128xf32, #tpu.memory_space<smem>>
    %358 = vector.broadcast %357 : f32 to vector<1x128xf32>
    %359 = arith.addf %356, %358 : vector<1x128xf32>
    %c0_13 = arith.constant 0 : index
    %c0_14 = arith.constant 0 : index
    %360 = vector.load %arg3[%c0_13, %c0_14] : memref<1x128xf32, #tpu.memory_space<vmem>>, vector<1x128xf32>
    tpu.vector_store %arg3[%c0_13, %c0_14], %359 {strides = array<i32>} : memref<1x128xf32, #tpu.memory_space<vmem>>, vector<1x128xf32>,
    return
  }
  func.func @transform_0(%arg0: i32) -> i32 {
    %c0_i32 = arith.constant 0 : i32
    %c0_i32_0 = arith.constant 0 : i32
    return %c0_i32 : i32
  }
  func.func @transform_1(%arg0: i32) -> (i32, i32) {
    %c0_i32 = arith.constant 0 : i32
    %c0_i32_0 = arith.constant 0 : i32
    return %c0_i32, %arg0 : i32, i32
  }
  func.func @transform_2(%arg0: i32) -> (i32, i32) {
    %c0_i32 = arith.constant 0 : i32
    %c0_i32_0 = arith.constant 0 : i32
    return %c0_i32, %arg0 : i32, i32
  }
}

</mosaic_0001>

<bundles_post_ra>
// kernel: tpu_custom_call.1
= control target key start
LH: loop header
LB: loop body
LE: loop exit
PB: predicated region body
PF: predicated region fallthrough
CT: control target
= control target key end

     0   :  { %7 = vsyncpa [#allocation5], 0  ;;  %s954_s0 = inlined_call_operand.hbm [shape: f32[128], index: 0, kind: input, shape index: {}]   ;;  %s955_s1 = inlined_call_operand.hbm [shape: f32[5,128], index: 1, kind: input, shape index: {}]   ;;  %s956_s2 = inlined_call_operand.hbm [shape: f32[1,128], index: 2, kind: output, shape index: {}]  }
   0x1   :  { %8 = vsyncpa [#allocation3], 0 }
   0x2   :  { %9 = vsyncpa [#allocation4], 0  ;;  %s15_s11 = sshll.u32 %s954_s0, 4  ;;  %s24_s14 = sshll.u32 %s955_s1, 4  ;;  %s16_s11 = int_to_ptr.hbm [resolvable:$true] %s15_s11  ;;  %s25_s14 = int_to_ptr.hbm [resolvable:$true] %s24_s14 }
   0x3   :  { %s654_s15 = smov [#allocation2]   ;;  %s655_s16 = smov [#allocation6]  }
   0x4   :  { %18 = dma.hbm_to_smem %s16_s11, 16, %s654_s15, [#allocation5]  }
   0x5   :  { %s26_s17 = sshll.u32 %s655_s16, 4  ;;  %s27_s17 = int_to_ptr.vmem [resolvable:$true] %s26_s17 }
   0x6   :  { %29 = dma.hbm_to_vmem [thread:$0]  %s25_s14, 128, %s27_s17, [#allocation3]  }
   0x7   :  { %648 = dma.done.wait [#allocation5], 16  }
   0x8   :  { %649 = vsyncadd [#allocation5], 4294967280 }
   0x9   :  { %650 = dma.done.wait [#allocation3], 128  }
   0xa   :  { %651 = vsyncadd [#allocation3], 4294967168 }
   0xb   :  { %38 = sfence }
   0xc   :  { %s40_s18 = sld [smem:[#allocation2]]  ;;  %v680_v0 = vld [vmem:[#allocation6] sm:$0x1f] }
   0xd   :  { %s497_s19 = sld [smem:[#allocation2 + $0x8]] }
   0xe   :  { %s498_s0 = sld [smem:[#allocation2 + $0x10]] }
   0xf   :  { %s499_s20 = sld [smem:[#allocation2 + $0x18]] }
  0x10   :  { %s678_s21 = sld [smem:[#allocation2 + $0x20]] }
  0x11   :  { %s682_s1 = sld [smem:[#allocation2 + $0x28]] }
  0x12   :  { %s684_s22 = sld [smem:[#allocation2 + $0x1]]  ;;  %v41_v1 = vstv %s40_s18 }
  0x13   :  { %v44_v2 = vstv %s497_s19  ;;  %s503_s23 = sld [smem:[#allocation2 + $0x9]]  ;;  %v42_v5 = vmul.f32 %v41_v1, %v680_v0 }
  0x14   :  { %v45_v3 = vmul.f32 %v44_v2, %v680_v0  ;;  %v51_v4 = vstv %s498_s0  ;;  %s504_s24 = sld [smem:[#allocation2 + $0x11]] }
  0x15   :  { %s687_s25 = sld [smem:[#allocation2 + $0x19]]  ;;  %v52_v7 = vmul.f32 %v51_v4, %v680_v0  ;;  %v58_v8 = vstv %s499_s20 }
  0x16   :  { %v47_v6 = vrot.slane %v45_v3, 1  ;;  %s691_s26 = sld [smem:[#allocation2 + $0x21]]  ;;  %v59_v12 = vmul.f32 %v58_v8, %v680_v0  ;;  %v65_v13 = vstv %s678_s21 }
  0x17   :  { %s693_s27 = sld [smem:[#allocation2 + $0x29]]  ;;  %v54_v11 = vrot.slane %v52_v7, 2  ;;  %v66_v19 = vmul.f32 %v65_v13, %v680_v0  ;;  %v72_v40 = vstv %s682_s1 }
  0x18   :  { %s695_s28 = sld [smem:[#allocation2 + $0x2]]  ;;  %v49_v10 = vadd.f32 %v47_v6, %v42_v5  ;;  %v76_v14 = vstv %s684_s22  ;;  %v61_v18 = vrot.slane %v59_v12, 3 }
  0x19   :  { %v79_v9 = vstv %s503_s23  ;;  %s509_s29 = sld [smem:[#allocation2 + $0xa]]  ;;  %v77_v20 = vmul.f32 %v76_v14, %v680_v0  ;;  %v68_v29 = vrot.slane %v66_v19, 4 }
  0x1a   :  { %s510_s30 = sld [smem:[#allocation2 + $0x12]]  ;;  %v80_v15 = vmul.f32 %v79_v9, %v680_v0  ;;  %v86_v16 = vstv %s504_s24  ;;  %v56_v17 = vadd.f32 %v54_v11, %v49_v10 }
  0x1b   :  { %s699_s3 = sld [smem:[#allocation2 + $0x1a]]  ;;  %v87_v21 = vmul.f32 %v86_v16, %v680_v0  ;;  %v93_v27 = vstv %s687_s25 }
  0x1c   :  { %s703_s4 = sld [smem:[#allocation2 + $0x22]]  ;;  %v82_v23 = vrot.slane %v80_v15, 1  ;;  %v63_v28 = vadd.f32 %v61_v18, %v56_v17  ;;  %v94_v36 = vmul.f32 %v93_v27, %v680_v0  ;;  %v100_v37 = vstv %s691_s26 }
  0x1d   :  { %s705_s5 = sld [smem:[#allocation2 + $0x2a]]  ;;  %v89_v35 = vrot.slane %v87_v21, 2  ;;  %v101_v49 = vmul.f32 %v100_v37, %v680_v0  ;;  %v107_v11 = vstv %s693_s27 }
  0x1e   :  { %s708_s6 = sld [smem:[#allocation2 + $0x3]]  ;;  %v111_v24 = vstv %s695_s28  ;;  %v84_v34 = vadd.f32 %v82_v23, %v77_v20  ;;  %v70_v39 = vadd.f32 %v68_v29, %v63_v28  ;;  %v96_v48 = vrot.slane %v94_v36, 3 }
  0x1f   :  { %v114_v22 = vstv %s509_s29  ;;  %s515_s7 = sld [smem:[#allocation2 + $0xb]]  ;;  %v112_v30 = vmul.f32 %v111_v24, %v680_v0  ;;  %v103_v62 = vrot.slane %v101_v49, 4 }
  0x20   :  { %v115_v25 = vmul.f32 %v114_v22, %v680_v0  ;;  %v121_v26 = vstv %s510_s30  ;;  %s714_s8 = sld [smem:[#allocation2 + $0x13]]  ;;  %v91_v47 = vadd.f32 %v89_v35, %v84_v34  ;;  %v73_v55 = vadd.f32 %v72_v40, %v70_v39 }
  0x21   :  { %s717_s9 = sld [smem:[#allocation2 + $0x1b]]  ;;  %v122_v32 = vmul.f32 %v121_v26, %v680_v0  ;;  %v128_v33 = vstv %s699_s3 }
  0x22   :  { %s719_s10 = sld [smem:[#allocation2 + $0x23]]  ;;  %v117_v31 = vrot.slane %v115_v25, 1  ;;  %v129_v41 = vmul.f32 %v128_v33, %v680_v0  ;;  %v135_v50 = vstv %s703_s4  ;;  %v98_v61 = vadd.f32 %v96_v48, %v91_v47 }
  0x23   :  { %s724_s11 = sld [smem:[#allocation2 + $0x2b]]  ;;  %v124_v44 = vrot.slane %v122_v32, 2  ;;  %v136_v58 = vmul.f32 %v135_v50, %v680_v0  ;;  %v770_v10 = vmax.f32 %v73_v55, 0.0  ;;  %v142_v15 = vstv %s705_s5 }
  0x24   :  { %s727_s12 = sld [smem:[#allocation2 + $0x4]]  ;;  %v146_v42 = vstv %s708_s6  ;;  %v119_v43 = vadd.f32 %v117_v31, %v112_v30  ;;  %v131_v56 = vrot.slane %v129_v41, 3  ;;  %v105_v14 = vadd.f32 %v103_v62, %v98_v61 }
  0x25   :  { %v149_v38 = vstv %s515_s7  ;;  %s730_s13 = sld [smem:[#allocation2 + $0xc]]  ;;  %v147_v51 = vmul.f32 %v146_v42, %v680_v0  ;;  %v138_v13 = vrot.slane %v136_v58, 4 }
  0x26   :  { %s735_s14 = sld [smem:[#allocation2 + $0x14]]  ;;  %v150_v45 = vmul.f32 %v149_v38, %v680_v0  ;;  %v156_v46 = vstv %s714_s8  ;;  %v126_v57 = vadd.f32 %v124_v44, %v119_v43  ;;  %v108_v30 = vadd.f32 %v107_v11, %v105_v14 }
  0x27   :  { %s739_s15 = sld [smem:[#allocation2 + $0x1c]]  ;;  %v157_v53 = vmul.f32 %v156_v46, %v680_v0  ;;  %v163_v54 = vstv %s717_s9 }
  0x28   :  { %s743_s16 = sld [smem:[#allocation2 + $0x24]]  ;;  %v152_v52 = vrot.slane %v150_v45, 1  ;;  %v164_v63 = vmul.f32 %v163_v54, %v680_v0  ;;  %v170_v4 = vstv %s719_s10  ;;  %v133_v12 = vadd.f32 %v131_v56, %v126_v57 }
  0x29   :  { %s748_s17 = sld [smem:[#allocation2 + $0x2c]]  ;;  %v159_v3 = vrot.slane %v157_v53, 2  ;;  %v171_v17 = vmul.f32 %v170_v4, %v680_v0  ;;  %v812_v50 = vmax.f32 %v108_v30, 0.0 }
  0x2a   :  { %s750_s18 = sld [smem:[#allocation2 + $0x5]]  ;;  %v181_v59 = vstv %s727_s12  ;;  %v154_v2 = vadd.f32 %v152_v52, %v147_v51  ;;  %v166_v16 = vrot.slane %v164_v63, 3  ;;  %v140_v26 = vadd.f32 %v138_v13, %v133_v12 }
  0x2b   :  { %v184_v60 = vstv %s730_s13  ;;  %s755_s19 = sld [smem:[#allocation2 + $0xd]]  ;;  %v182_v6 = vmul.f32 %v181_v59, %v680_v0  ;;  %v173_v35 = vrot.slane %v171_v17, 4  ;;  %v177_v59 = vstv %s724_s11 }
  0x2c   :  { %v185_v1 = vmul.f32 %v184_v60, %v680_v0  ;;  %s759_s0 = sld [smem:[#allocation2 + $0x15]]  ;;  %v191_v5 = vstv %s735_s14  ;;  %v161_v18 = vadd.f32 %v159_v3, %v154_v2  ;;  %v143_v42 = vadd.f32 %v142_v15, %v140_v26 }
  0x2d   :  { %s763_s20 = sld [smem:[#allocation2 + $0x1d]]  ;;  %v192_v8 = vmul.f32 %v191_v5, %v680_v0  ;;  %v198_v9 = vstv %s739_s15 }
  0x2e   :  { %v187_v7 = vrot.slane %v185_v1, 1  ;;  %s768_s21 = sld [smem:[#allocation2 + $0x25]]  ;;  %v199_v19 = vmul.f32 %v198_v9, %v680_v0  ;;  %v205_v27 = vstv %s743_s16  ;;  %v168_v34 = vadd.f32 %v166_v16, %v161_v18 }
  0x2f   :  { %s773_s1 = sld [smem:[#allocation2 + $0x2d]]  ;;  %v194_v23 = vrot.slane %v192_v8, 2  ;;  %v206_v39 = vmul.f32 %v205_v27, %v680_v0  ;;  %v821_v58 = vmax.f32 %v143_v42, 0.0  ;;  %v212_v9 = vstv %s748_s17 }
  0x30   :  { %s777_s22 = sld [smem:[#allocation2 + $0x6]]  ;;  %v216_v20 = vstv %s750_s18  ;;  %v189_v22 = vadd.f32 %v187_v7, %v182_v6  ;;  %v201_v36 = vrot.slane %v199_v19, 3  ;;  %v175_v51 = vadd.f32 %v173_v35, %v168_v34 }
  0x31   :  { %v219_v21 = vstv %s755_s19  ;;  %s782_s23 = sld [smem:[#allocation2 + $0xe]]  ;;  %v217_v24 = vmul.f32 %v216_v20, %v680_v0  ;;  %v208_v55 = vrot.slane %v206_v39, 4 }
  0x32   :  { %v220_v25 = vmul.f32 %v219_v21, %v680_v0  ;;  %s786_s24 = sld [smem:[#allocation2 + $0x16]]  ;;  %v226_v28 = vstv %s759_s0  ;;  %v196_v38 = vadd.f32 %v194_v23, %v189_v22  ;;  %v178_v7 = vadd.f32 %v177_v59, %v175_v51 }
  0x33   :  { %v233_v29 = vstv %s763_s20  ;;  %s791_s25 = sld [smem:[#allocation2 + $0x1e]]  ;;  %v227_v32 = vmul.f32 %v226_v28, %v680_v0 }
  0x34   :  { %v222_v31 = vrot.slane %v220_v25, 1  ;;  %v234_v33 = vmul.f32 %v233_v29, %v680_v0  ;;  %s795_s26 = sld [smem:[#allocation2 + $0x26]]  ;;  %v240_v37 = vstv %s768_s21  ;;  %v203_v54 = vadd.f32 %v201_v36, %v196_v38 }
  0x35   :  { %s798_s27 = sld [smem:[#allocation2 + $0x2e]]  ;;  %v229_v41 = vrot.slane %v227_v32, 2  ;;  %v241_v47 = vmul.f32 %v240_v37, %v680_v0  ;;  %v247_v17 = vstv %s773_s1 }
  0x36   :  { %v224_v40 = vadd.f32 %v222_v31, %v217_v24  ;;  %s801_s28 = sld [smem:[#allocation2 + $0x7]]  ;;  %v236_v43 = vrot.slane %v234_v33, 3  ;;  %v251_v44 = vstv %s777_s22  ;;  %v210_v8 = vadd.f32 %v208_v55, %v203_v54 }
  0x37   :  { %v254_v45 = vstv %s782_s23  ;;  %s805_s29 = sld [smem:[#allocation2 + $0xf]]  ;;  %v252_v48 = vmul.f32 %v251_v44, %v680_v0  ;;  %v243_v63 = vrot.slane %v241_v47, 4  ;;  %v852_v24 = vmax.f32 %v178_v7, 0.0 }
  0x38   :  { %v231_v46 = vadd.f32 %v229_v41, %v224_v40  ;;  %v255_v49 = vmul.f32 %v254_v45, %v680_v0  ;;  %s810_s30 = sld [smem:[#allocation2 + $0x17]]  ;;  %v261_v52 = vstv %s786_s24  ;;  %v213_v25 = vadd.f32 %v212_v9, %v210_v8 }
  0x39   :  { %v268_v53 = vstv %s791_s25  ;;  %s816_s3 = sld [smem:[#allocation2 + $0x1f]]  ;;  %v262_v57 = vmul.f32 %v261_v52, %v680_v0 }
  0x3a   :  { %v257_v56 = vrot.slane %v255_v49, 1  ;;  %s819_s4 = sld [smem:[#allocation2 + $0x27]]  ;;  %v269_v60 = vmul.f32 %v268_v53, %v680_v0  ;;  %v275_v61 = vstv %s795_s26  ;;  %v238_v62 = vadd.f32 %v236_v43, %v231_v46 }
  0x3b   :  { %s826_s5 = sld [smem:[#allocation2 + $0x2f]]  ;;  %v264_v2 = vrot.slane %v262_v57, 2  ;;  %v276_v4 = vmul.f32 %v275_v61, %v680_v0  ;;  %v282_v38 = vstv %s798_s27  ;;  %v869_v42 = vmax.f32 %v213_v25, 0.0 }
  0x3c   :  { %v259_v1 = vadd.f32 %v257_v56, %v252_v48  ;;  %s828_s6 = sld [smem:[#allocation2 + $0x30]]  ;;  %v271_v3 = vrot.slane %v269_v60, 3  ;;  %v286_v5 = vstv %s801_s28  ;;  %v245_v16 = vadd.f32 %v243_v63, %v238_v62 }
  0x3d   :  { %v289_v6 = vstv %s805_s29  ;;  %s833_s7 = sld [smem:[#allocation2 + $0x34]]  ;;  %v287_v12 = vmul.f32 %v286_v5, %v680_v0  ;;  %v278_v21 = vrot.slane %v276_v4, 4 }
  0x3e   :  { %v266_v11 = vadd.f32 %v264_v2, %v259_v1  ;;  %s836_s8 = sld [smem:[#allocation2 + $0x38]]  ;;  %v290_v13 = vmul.f32 %v289_v6, %v680_v0  ;;  %v296_v14 = vstv %s810_s30  ;;  %v248_v32 = vadd.f32 %v247_v17, %v245_v16 }
  0x3f   :  { %v303_v15 = vstv %s816_s3  ;;  %s842_s9 = sld [smem:[#allocation2 + $0x3c]]  ;;  %v297_v18 = vmul.f32 %v296_v14, %v680_v0 }
  0x40   :  { %v304_v19 = vmul.f32 %v303_v15, %v680_v0  ;;  %s847_s10 = sld [smem:[#allocation2 + $0x40]]  ;;  %v273_v20 = vadd.f32 %v271_v3, %v266_v11  ;;  %v292_v22 = vrot.slane %v290_v13, 1  ;;  %v310_v23 = vstv %s819_s4 }
  0x41   :  { %s850_s11 = sld [smem:[#allocation2 + $0x44]]  ;;  %v299_v26 = vrot.slane %v297_v18, 2  ;;  %v311_v27 = vmul.f32 %v310_v23, %v680_v0  ;;  %v873_v47 = vmax.f32 %v248_v32, 0.0  ;;  %v317_v52 = vstv %s826_s5 }
  0x42   :  { %s855_s12 = sld [smem:[#allocation2 + $0x48]]  ;;  %v294_v28 = vadd.f32 %v292_v22, %v287_v12  ;;  %v306_v29 = vrot.slane %v304_v19, 3  ;;  %v321_v30 = vstv %s828_s6  ;;  %v280_v35 = vadd.f32 %v278_v21, %v273_v20 }
  0x43   :  { %v324_v31 = vstv %s833_s7  ;;  %s859_s13 = sld [smem:[#allocation2 + $0x4c]]  ;;  %v322_v33 = vmul.f32 %v321_v30, %v770_v10  ;;  %v313_v39 = vrot.slane %v311_v27, 4 }
  0x44   :  { %v325_v34 = vmul.f32 %v324_v31, %v812_v50  ;;  %s863_s14 = sld [smem:[#allocation2 + $0x50]]  ;;  %v301_v36 = vadd.f32 %v299_v26, %v294_v28  ;;  %v328_v0 = vstv %s836_s8  ;;  %v283_v48 = vadd.f32 %v282_v38, %v280_v35 }
  0x45   :  { %v332_v37 = vstv %s842_s9  ;;  %s553_s15 = sld [smem:[#allocation2 + $0x31]]  ;;  %v329_v41 = vmul.f32 %v328_v0, %v821_v58 }
  0x46   :  { %v326_v40 = vadd.f32 %v325_v34, %v322_v33  ;;  %s554_s16 = sld [smem:[#allocation2 + $0x35]]  ;;  %v308_v43 = vadd.f32 %v306_v29, %v301_v36  ;;  %v333_v44 = vmul.f32 %v332_v37, %v852_v24  ;;  %v336_v46 = vstv %s847_s10 }
  0x47   :  { %s555_s17 = sld [smem:[#allocation2 + $0x39]]  ;;  %v340_v51 = vstv %s850_s11  ;;  %v337_v54 = vmul.f32 %v336_v46, %v869_v42  ;;  %v885_v59 = vmax.f32 %v283_v48, 0.0 }
  0x48   :  { %v330_v45 = vadd.f32 %v329_v41, %v326_v40  ;;  %s556_s18 = sld [smem:[#allocation2 + $0x3d]]  ;;  %v315_v49 = vadd.f32 %v313_v39, %v308_v43  ;;  %v341_v60 = vmul.f32 %v340_v51, %v873_v47  ;;  %v344_v1 = vstv %s855_s12 }
  0x49   :  { %s557_s19 = sld [smem:[#allocation2 + $0x41]]  ;;  %v345_v13 = vmul.f32 %v344_v1, %v885_v59  ;;  %v348_v16 = vstv %s859_s13 }
  0x4a   :  { %s876_s0 = sld [smem:[#allocation2 + $0x45]]  ;;  %v334_v53 = vadd.f32 %v333_v44, %v330_v45  ;;  %v318_v63 = vadd.f32 %v317_v52, %v315_v49  ;;  %v352_v43 = vstv %s863_s14 }
  0x4b   :  { %v356_v55 = vstv %s553_s15  ;;  %s880_s20 = sld [smem:[#allocation2 + $0x49]] }
  0x4c   :  { %v357_v56 = vmul.f32 %v356_v55, %v770_v10  ;;  %v359_v57 = vstv %s554_s16  ;;  %s883_s21 = sld [smem:[#allocation2 + $0x4d]]  ;;  %v338_v4 = vadd.f32 %v337_v54, %v334_v53  ;;  %v896_v12 = vmax.f32 %v318_v63, 0.0 }
  0x4d   :  { %v360_v61 = vmul.f32 %v359_v57, %v812_v50  ;;  %v363_v62 = vstv %s555_s17  ;;  %s889_s1 = sld [smem:[#allocation2 + $0x51]]  ;;  %s656_s17 = smov [#allocation7]  }
  0x4e   :  { %v364_v2 = vmul.f32 %v363_v62, %v821_v58  ;;  %v367_v3 = vstv %s556_s18  ;;  %s562_s22 = sld [smem:[#allocation2 + $0x32]]  ;;  %v342_v15 = vadd.f32 %v341_v60, %v338_v4  ;;  %v349_v25 = vmul.f32 %v348_v16, %v896_v12  ;;  %s484_s18 = sshll.u32 %s656_s17, 4  ;;  %s485_s18 = int_to_ptr.vmem [resolvable:$true] %s484_s18 }
  0x4f   :  { %v361_v5 = vadd.f32 %v360_v61, %v357_v56  ;;  %v368_v6 = vmul.f32 %v367_v3, %v852_v24  ;;  %v371_v7 = vstv %s557_s19  ;;  %s563_s23 = sld [smem:[#allocation2 + $0x36]] }
  0x50   :  { %v375_v8 = vstv %s876_s0  ;;  %s564_s24 = sld [smem:[#allocation2 + $0x3a]]  ;;  %v372_v11 = vmul.f32 %v371_v7, %v869_v42  ;;  %v346_v29 = vadd.f32 %v345_v13, %v342_v15 }
  0x51   :  { %v365_v9 = vadd.f32 %v364_v2, %v361_v5  ;;  %s565_s25 = sld [smem:[#allocation2 + $0x3e]]  ;;  %v379_v14 = vstv %s880_s20  ;;  %v376_v18 = vmul.f32 %v375_v8, %v873_v47  ;;  %s486_s20 = sshll.u32 %s956_s2, 4  ;;  %s487_s20 = int_to_ptr.hbm [resolvable:$true] %s486_s20 }
  0x52   :  { %s900_s26 = sld [smem:[#allocation2 + $0x42]]  ;;  %v380_v21 = vmul.f32 %v379_v14, %v885_v59  ;;  %v383_v26 = vstv %s883_s21  ;;  %v350_v40 = vadd.f32 %v349_v25, %v346_v29 }
  0x53   :  { %v369_v17 = vadd.f32 %v368_v6, %v365_v9  ;;  %s904_s27 = sld [smem:[#allocation2 + $0x46]]  ;;  %v384_v0 = vmul.f32 %v383_v26, %v896_v12  ;;  %v387_v48 = vstv %s889_s1 }
  0x54   :  { %v391_v19 = vstv %s562_s22  ;;  %s906_s28 = sld [smem:[#allocation2 + $0x4a]]  ;;  %v353_v56 = vadd.f32 %v352_v43, %v350_v40 }
  0x55   :  { %v373_v20 = vadd.f32 %v372_v11, %v369_v17  ;;  %v392_v22 = vmul.f32 %v391_v19, %v770_v10  ;;  %v394_v23 = vstv %s563_s23  ;;  %s910_s29 = sld [smem:[#allocation2 + $0x4e]] }
  0x56   :  { %v395_v27 = vmul.f32 %v394_v23, %v812_v50  ;;  %v398_v28 = vstv %s564_s24  ;;  %s915_s30 = sld [smem:[#allocation2 + $0x52]]  ;;  %v354_v9 = vmax.f32 %v353_v56, 0.0 }
  0x57   :  { %v377_v30 = vadd.f32 %v376_v18, %v373_v20  ;;  %v399_v31 = vmul.f32 %v398_v28, %v821_v58  ;;  %v402_v32 = vstv %s565_s25  ;;  %s571_s3 = sld [smem:[#allocation2 + $0x33]] }
  0x58   :  { %v396_v33 = vadd.f32 %v395_v27, %v392_v22  ;;  %v403_v34 = vmul.f32 %v402_v32, %v852_v24  ;;  %v406_v35 = vstv %s900_s26  ;;  %s572_s4 = sld [smem:[#allocation2 + $0x37]] }
  0x59   :  { %v381_v36 = vadd.f32 %v380_v21, %v377_v30  ;;  %v410_v37 = vstv %s904_s27  ;;  %s573_s5 = sld [smem:[#allocation2 + $0x3b]]  ;;  %v407_v39 = vmul.f32 %v406_v35, %v869_v42 }
  0x5a   :  { %v400_v38 = vadd.f32 %v399_v31, %v396_v33  ;;  %s574_s6 = sld [smem:[#allocation2 + $0x3f]]  ;;  %v414_v41 = vstv %s906_s28  ;;  %v411_v45 = vmul.f32 %v410_v37, %v873_v47 }
  0x5b   :  { %s924_s7 = sld [smem:[#allocation2 + $0x43]]  ;;  %v385_v46 = vadd.f32 %v384_v0, %v381_v36  ;;  %v418_v49 = vstv %s910_s29  ;;  %v415_v53 = vmul.f32 %v414_v41, %v885_v59 }
  0x5c   :  { %v404_v44 = vadd.f32 %v403_v34, %v400_v38  ;;  %s928_s8 = sld [smem:[#allocation2 + $0x47]]  ;;  %v419_v62 = vmul.f32 %v418_v49, %v896_v12 }
  0x5d   :  { %v426_v51 = vstv %s571_s3  ;;  %s932_s9 = sld [smem:[#allocation2 + $0x4b]]  ;;  %v388_v2 = vadd.f32 %v387_v48, %v385_v46 }
  0x5e   :  { %v408_v52 = vadd.f32 %v407_v39, %v404_v44  ;;  %v427_v54 = vmul.f32 %v426_v51, %v770_v10  ;;  %v429_v55 = vstv %s572_s4  ;;  %s936_s10 = sld [smem:[#allocation2 + $0x4f]] }
  0x5f   :  { %v430_v57 = vmul.f32 %v429_v55, %v812_v50  ;;  %v433_v60 = vstv %s573_s5  ;;  %s580_s11 = sld [smem:[#allocation2 + $0x54]]  ;;  %v422_v50 = vstv %s915_s30  ;;  %v389_v13 = vmax.f32 %v388_v2, 0.0 }
  0x60   :  { %v412_v61 = vadd.f32 %v411_v45, %v408_v52  ;;  %v434_v63 = vmul.f32 %v433_v60, %v821_v58  ;;  %v437_v1 = vstv %s574_s6  ;;  %s581_s12 = sld [smem:[#allocation2 + $0x55]] }
  0x61   :  { %v431_v3 = vadd.f32 %v430_v57, %v427_v54  ;;  %v438_v10 = vmul.f32 %v437_v1, %v852_v24  ;;  %v441_v4 = vstv %s924_s7  ;;  %s582_s13 = sld [smem:[#allocation2 + $0x56]] }
  0x62   :  { %v416_v5 = vadd.f32 %v415_v53, %v412_v61  ;;  %v445_v6 = vstv %s928_s8  ;;  %v442_v8 = vmul.f32 %v441_v4, %v869_v42  ;;  %s579_s14 = sld [smem:[#allocation2 + $0x53]] }
  0x63   :  { %v435_v7 = vadd.f32 %v434_v63, %v431_v3  ;;  %v449_v58 = vstv %s932_s9  ;;  %v446_v15 = vmul.f32 %v445_v6, %v873_v47  ;;  %s583_s15 = sld [smem:[#allocation2 + $0x57]] }
  0x64   :  { %v420_v11 = vadd.f32 %v419_v62, %v416_v5  ;;  %v453_v16 = vstv %s936_s10  ;;  %v450_v19 = vmul.f32 %v449_v58, %v885_v59  ;;  %s584_s16 = sld [smem:[#allocation2 + $0x58]] }
  0x65   :  { %v439_v14 = vadd.f32 %v438_v10, %v435_v7  ;;  %v461_v17 = vstv %s580_s11  ;;  %v454_v21 = vmul.f32 %v453_v16, %v896_v12 }
  0x66   :  { %v423_v24 = vadd.f32 %v422_v50, %v420_v11  ;;  %v464_v20 = vstv %s581_s12  ;;  %v462_v23 = vmul.f32 %v461_v17, %v354_v9 }
  0x67   :  { %v443_v18 = vadd.f32 %v442_v8, %v439_v14  ;;  %v465_v25 = vmul.f32 %v464_v20, %v389_v13  ;;  %v468_v26 = vstv %s582_s13 }
  0x68   :  { %v424_v22 = vmax.f32 %v423_v24, 0.0  ;;  %v457_v28 = vstv %s579_s14 }
  0x69   :  { %v447_v42 = vadd.f32 %v446_v15, %v443_v18  ;;  %v466_v47 = vadd.f32 %v465_v25, %v462_v23  ;;  %v472_v32 = vstv %s583_s15 }
  0x6a   :  { %v469_v30 = vmul.f32 %v468_v26, %v424_v22  ;;  %v476_v35 = vstv %s584_s16 }
  0x6b   :  { %v451_v27 = vadd.f32 %v450_v19, %v447_v42 }
  0x6c   :  { %v470_v34 = vadd.f32 %v469_v30, %v466_v47 }
  0x6d   :  { %v455_v29 = vadd.f32 %v454_v21, %v451_v27 }
  0x6f   :  { %v458_v31 = vadd.f32 %v457_v28, %v455_v29 }
  0x71   :  { %v459_v33 = vmax.f32 %v458_v31, 0.0 }
  0x73   :  { %v473_v59 = vmul.f32 %v472_v32, %v459_v33 }
  0x75   :  { %v474_v12 = vadd.f32 %v473_v59, %v470_v34 }
  0x77   :  { %v477_v36 = vadd.f32 %v476_v35, %v474_v12 }
  0x79   :  { %478 = vst [vmem:[#allocation7] sm:$0x1] %v477_v36 }
  0x7a   :  { %489 = dma.vmem_to_hbm [thread:$0]  %s485_s18, 16, %s487_s20, [#allocation4]  }
  0x7b   :  { %652 = dma.done.wait [#allocation4], 16  }
  0x7c   :  { %653 = vsyncadd [#allocation4], 4294967280 }
  0x7d   :  { %494 = vsyncpa [#allocation3], 1 }
  0x7e   :  { %495 = vsyncpa [#allocation4], 1 }
  0x7f   :  { %496 = vsyncpa [#allocation5], 1 }

</bundles_post_ra>
